<compile_context>
chip_gen: v7x
topology: tpu7x:2x2x1
jax: 0.10.0
libtpu: 0.0.40
codegen_flags: <defaults>
</compile_context>

<pallas_src>
import functools

import jax
import jax.numpy as jnp
from jax.experimental import pallas as pl
from jax.experimental.pallas import tpu as pltpu

_LANE = 128
_SUBLANE = 8
_VMEM_BUDGET = 12 * 1024 * 1024  # double-buffered input footprint target


def _round_up(v, m):
    return (v + m - 1) // m * m


def _contrastive_partial_kernel(x0_ref, x1_ref, y_ref, out_ref, *,
                                margin, n_rows, block_rows, mask_tail):
    # Native-dtype tiles -> f32 for the math.
    x0 = x0_ref[...].astype(jnp.float32)          # (tn, D)
    x1 = x1_ref[...].astype(jnp.float32)          # (tn, D)
    y = y_ref[...].astype(jnp.float32)            # (tn, 1)

    diff = x0 - x1
    dist_sq = jnp.sum(diff * diff, axis=1, keepdims=True)   # (tn, 1)
    dist = jnp.sqrt(dist_sq)
    clamped = jnp.maximum(margin - dist, 0.0)
    per_row = y * dist_sq + (1.0 - y) * (clamped * clamped)  # (tn, 1)

    if mask_tail:
        # Zero out rows past the true batch size (tail block only reads
        # unspecified padding there); `where` select kills any garbage/NaN.
        row0 = pl.program_id(0) * block_rows
        rows = row0 + jax.lax.broadcasted_iota(jnp.int32, per_row.shape, 0)
        per_row = jnp.where(rows < n_rows, per_row, 0.0)

    # Lane-dense unmasked store of this block's partial sum.
    out_ref[...] = jnp.broadcast_to(jnp.sum(per_row), out_ref.shape)


def contrastive_loss(x0, x1, y, margin=1.0, *, block_rows=2048):
    """JAX/Pallas equivalent of ContrastiveLoss.forward(x0, x1, y)."""
    assert x0.ndim == 2 and x1.ndim == 2 and y.ndim == 1
    assert x0.shape == x1.shape
    assert x1.shape[0] == y.shape[0] and x1.shape[0] > 0

    n, d = x0.shape
    y2 = y.reshape(n, 1)

    # ---- Row-tile selection from a VMEM byte budget (lane-padded widths). ----
    x_itemsize = jnp.dtype(x0.dtype).itemsize
    y_itemsize = jnp.dtype(y2.dtype).itemsize
    d_lanes = _round_up(d, _LANE)
    # Per row, double-buffered: x0 + x1 tiles plus the lane-padded y column.
    per_row_bytes = 2 * (2 * d_lanes * x_itemsize + _LANE * y_itemsize)
    tn = _VMEM_BUDGET // per_row_bytes
    tn = max(_SUBLANE, (min(tn, block_rows) // _SUBLANE) * _SUBLANE)
    tn = min(tn, _round_up(n, _SUBLANE))          # don't exceed the batch

    num_blocks = pl.cdiv(n, tn)
    # v7x megacore: make sure a mid/large batch produces >= 2 parallel blocks.
    if num_blocks == 1 and n >= 1024:
        tn = min(tn, _round_up(pl.cdiv(n, 2), _SUBLANE))
        num_blocks = pl.cdiv(n, tn)

    mask_tail = (n % tn) != 0

    footprint = (2 * (2 * tn * d_lanes * x_itemsize + tn * _LANE * y_itemsize)
                 + 2 * _SUBLANE * _LANE * 4)
    vmem_limit = int(min(64 * 1024 * 1024,
                         max(32 * 1024 * 1024, footprint + (4 << 20))))

    kernel = functools.partial(
        _contrastive_partial_kernel,
        margin=float(margin), n_rows=n, block_rows=tn, mask_tail=mask_tail)

    partials = pl.pallas_call(
        kernel,
        out_shape=jax.ShapeDtypeStruct((num_blocks, _SUBLANE, _LANE),
                                       jnp.float32),
        grid=(num_blocks,),
        in_specs=[
            pl.BlockSpec((tn, d), lambda i: (i, 0)),
            pl.BlockSpec((tn, d), lambda i: (i, 0)),
            pl.BlockSpec((tn, 1), lambda i: (i, 0)),
        ],
        out_specs=pl.BlockSpec((1, _SUBLANE, _LANE), lambda i: (i, 0, 0)),
        compiler_params=pltpu.CompilerParams(
            dimension_semantics=("parallel",),
            vmem_limit_bytes=vmem_limit),
    )(x0, x1, y2)

    # Single fused epilogue scale: sum of per-block partials * (0.5 / n).
    return jnp.sum(partials[:, 0, 0]) * (0.5 / n)


def _reference(x0, x1, y, margin=1.0):
    x0 = x0.astype(jnp.float32)
    x1 = x1.astype(jnp.float32)
    y = y.astype(jnp.float32)
    diff = x0 - x1
    dist_sq = jnp.sum(diff ** 2, axis=1)
    dist = jnp.sqrt(dist_sq)
    dist_c = jnp.maximum(margin - dist, 0.0)
    loss = y * dist_sq + (1.0 - y) * dist_c ** 2
    return jnp.sum(loss) / 2.0 / x0.shape[0]


if __name__ == "__main__":
    key = jax.random.PRNGKey(0)

    # Case 1: small shape implied by the module tests (single full-extent block).
    k0, k1, k2 = jax.random.split(key, 3)
    N, D = 8, 32
    x0 = jax.random.normal(k0, (N, D), dtype=jnp.float32)
    x1 = jax.random.normal(k1, (N, D), dtype=jnp.float32)
    y = jax.random.bernoulli(k2, p=0.5, shape=(N,)).astype(jnp.float32)

    loss = contrastive_loss(x0, x1, y, margin=1.0)
    jax.block_until_ready(loss)
    ref = _reference(x0, x1, y, margin=1.0)
    assert jnp.allclose(loss, ref, rtol=1e-5, atol=1e-5), (loss, ref)

    # Case 2: batch not a tile multiple -> exercises multi-block + tail mask.
    k3, k4, k5 = jax.random.split(jax.random.PRNGKey(1), 3)
    N2, D2 = 300, 64
    x0b = jax.random.normal(k3, (N2, D2), dtype=jnp.float32)
    x1b = jax.random.normal(k4, (N2, D2), dtype=jnp.float32)
    yb = jax.random.bernoulli(k5, p=0.5, shape=(N2,)).astype(jnp.float32)

    loss2 = contrastive_loss(x0b, x1b, yb, margin=1.0, block_rows=128)
    jax.block_until_ready(loss2)
    ref2 = _reference(x0b, x1b, yb, margin=1.0)
    assert jnp.allclose(loss2, ref2, rtol=1e-5, atol=1e-5), (loss2, ref2)

    # Case 3: larger batch -> exercises the >=2-block (megacore) split path.
    k6, k7, k8 = jax.random.split(jax.random.PRNGKey(2), 3)
    N3, D3 = 1200, 32
    x0c = jax.random.normal(k6, (N3, D3), dtype=jnp.float32)
    x1c = jax.random.normal(k7, (N3, D3), dtype=jnp.float32)
    yc = jax.random.bernoulli(k8, p=0.5, shape=(N3,)).astype(jnp.float32)

    loss3 = contrastive_loss(x0c, x1c, yc, margin=1.0)
    jax.block_until_ready(loss3)
    ref3 = _reference(x0c, x1c, yc, margin=1.0)
    assert jnp.allclose(loss3, ref3, rtol=1e-5, atol=1e-5), (loss3, ref3)

    print("KERNEL_OK")
</pallas_src>

<mosaic_0001>
module attributes {stable_mosaic.version = 11 : i64} {
  func.func @_contrastive_partial_kernel(%arg0: i32, %arg1: memref<8x32xf32, #tpu.memory_space<vmem>>, %arg2: memref<8x32xf32, #tpu.memory_space<vmem>>, %arg3: memref<8x1xf32, #tpu.memory_space<vmem>>, %arg4: memref<1x8x128xf32, #tpu.memory_space<vmem>>) attributes {dimension_semantics = [#tpu.dimension_semantics<parallel>], iteration_bounds = array<i64: 1>, scalar_prefetch = 0 : i64, scratch_operands = 0 : i64, tpu.core_type = #tpu.core_type<tc>, window_params = [{transform_indices = @transform_0, window_bounds = array<i64: 8, 32>}, {transform_indices = @transform_1, window_bounds = array<i64: 8, 32>}, {transform_indices = @transform_2, window_bounds = array<i64: 8, 1>}, {transform_indices = @transform_3, window_bounds = array<i64: 1, 8, 128>}]} {
    %c0 = arith.constant 0 : index
    %c0_0 = arith.constant 0 : index
    %0 = vector.load %arg1[%c0, %c0_0] : memref<8x32xf32, #tpu.memory_space<vmem>>, vector<8x32xf32>
    %c0_1 = arith.constant 0 : index
    %c0_2 = arith.constant 0 : index
    %1 = vector.load %arg2[%c0_1, %c0_2] : memref<8x32xf32, #tpu.memory_space<vmem>>, vector<8x32xf32>
    %c0_3 = arith.constant 0 : index
    %c0_4 = arith.constant 0 : index
    %2 = vector.load %arg3[%c0_3, %c0_4] : memref<8x1xf32, #tpu.memory_space<vmem>>, vector<8x1xf32>
    %3 = arith.subf %0, %1 : vector<8x32xf32>
    %4 = arith.mulf %3, %3 : vector<8x32xf32>
    %cst = arith.constant dense<0.000000e+00> : vector<8xf32>
    %5 = vector.multi_reduction <add>, %4, %cst [1] : vector<8x32xf32> to vector<8xf32>
    %6 = vector.shape_cast %5 : vector<8xf32> to vector<8x1xf32>
    %7 = math.sqrt %6 : vector<8x1xf32>
    %cst_5 = arith.constant 1.000000e+00 : f32
    %8 = vector.broadcast %cst_5 : f32 to vector<8x1xf32>
    %9 = arith.subf %8, %7 : vector<8x1xf32>
    %cst_6 = arith.constant 0.000000e+00 : f32
    %10 = vector.broadcast %cst_6 : f32 to vector<8x1xf32>
    %11 = arith.maximumf %9, %10 : vector<8x1xf32>
    %12 = arith.mulf %2, %6 : vector<8x1xf32>
    %cst_7 = arith.constant 1.000000e+00 : f32
    %13 = vector.broadcast %cst_7 : f32 to vector<8x1xf32>
    %14 = arith.subf %13, %2 : vector<8x1xf32>
    %15 = arith.mulf %11, %11 : vector<8x1xf32>
    %16 = arith.mulf %14, %15 : vector<8x1xf32>
    %17 = arith.addf %12, %16 : vector<8x1xf32>
    %18 = vector.shape_cast %17 : vector<8x1xf32> to vector<1x8x1xf32>
    %cst_8 = arith.constant dense<0.000000e+00> : vector<1xf32>
    %19 = vector.multi_reduction <add>, %18, %cst_8 [1, 2] : vector<1x8x1xf32> to vector<1xf32>
    %20 = vector.shape_cast %19 : vector<1xf32> to vector<1x1x1xf32>
    %21 = vector.extract %20[0, 0, 0] : f32 from vector<1x1x1xf32>
    %22 = vector.broadcast %21 : f32 to vector<1x8x128xf32>
    %c0_9 = arith.constant 0 : index
    %c0_10 = arith.constant 0 : index
    %c0_11 = arith.constant 0 : index
    %23 = vector.load %arg4[%c0_9, %c0_10, %c0_11] : memref<1x8x128xf32, #tpu.memory_space<vmem>>, vector<1x8x128xf32>
    tpu.vector_store %arg4[%c0_9, %c0_10, %c0_11], %22 {strides = array<i32>} : memref<1x8x128xf32, #tpu.memory_space<vmem>>, vector<1x8x128xf32>,
    return
  }
  func.func @transform_0(%arg0: i32) -> (i32, i32) {
    %c0_i32 = arith.constant 0 : i32
    %c0_i32_0 = arith.constant 0 : i32
    return %arg0, %c0_i32 : i32, i32
  }
  func.func @transform_1(%arg0: i32) -> (i32, i32) {
    %c0_i32 = arith.constant 0 : i32
    %c0_i32_0 = arith.constant 0 : i32
    return %arg0, %c0_i32 : i32, i32
  }
  func.func @transform_2(%arg0: i32) -> (i32, i32) {
    %c0_i32 = arith.constant 0 : i32
    %c0_i32_0 = arith.constant 0 : i32
    return %arg0, %c0_i32 : i32, i32
  }
  func.func @transform_3(%arg0: i32) -> (i32, i32, i32) {
    %c0_i32 = arith.constant 0 : i32
    %c0_i32_0 = arith.constant 0 : i32
    %c0_i32_1 = arith.constant 0 : i32
    return %arg0, %c0_i32, %c0_i32_0 : i32, i32, i32
  }
}

</mosaic_0001>

<bundles_post_ra>
// kernel: tpu_custom_call.1
= control target key start
LH: loop header
LB: loop body
LE: loop exit
PB: predicated region body
PF: predicated region fallthrough
CT: control target
= control target key end

     0   :  { %8 = vsyncpa [#allocation3], 0  ;;  %s184_s0 = inlined_call_operand.vmem [shape: f32[8,32], index: 0, kind: input, shape index: {}]   ;;  %s185_s1 = inlined_call_operand.hbm [shape: f32[8,32], index: 1, kind: input, shape index: {}]   ;;  %s186_s2 = inlined_call_operand.vmem [shape: f32[8,1], index: 2, kind: input, shape index: {}]   ;;  %s187_s3 = inlined_call_operand.hbm [shape: f32[1,8,128], index: 3, kind: output, shape index: {}]  }
   0x1   :  { %9 = vsyncpa [#allocation4], 0  ;;  %s132_s12 = smov [#allocation2]   ;;  %s84_s16 = scalar_lea.hbm %s185_s1, 128 }
   0x2   :  { %s18_s13 = sshll.u32 %s132_s12, 4  ;;  %p85_p0 = scmp.ne.s32.totalorder %s185_s1, %s84_s16  ;;  %s19_s13 = int_to_ptr.vmem [resolvable:$true] %s18_s13 }
   0x3   :  { %p88_p1 = scmp.lt.u32.totalorder %s84_s16, %s185_s1 }
   0x5   :  { %p90_p2 = pnand %p88_p1, %p85_p0 }
   0x7   :  { %93 = shalt.err (!%p90_p2)
}
   0x8   :  { %s94_s21 = scalar_lea.vmem %s19_s13, 128  ;;  %p99_p4 = scmp.lt.s32.totalorder %s19_s13, %s19_s13 }
   0x9   :  { %p95_p3 = scmp.ne.s32.totalorder %s19_s13, %s94_s21  ;;  %p100_p5 = scmp.lt.s32.totalorder %s94_s21, %s94_s21 }
   0xb   :  { %p101_p6 = por %p100_p5, %p99_p4 }
   0xd   :  { %p102_p7 = pnand %p101_p6, %p95_p3 }
   0xf   :  { %105 = shalt.err (!%p102_p7)
}
  0x10   :  { %21 = dma.hbm_to_vmem [thread:$0]  %s185_s1, 128, %s19_s13, [#allocation3]  }
  0x11   :  { %128 = dma.done.wait [#allocation3], 128  }
  0x12   :  { %129 = vsyncadd [#allocation3], 4294967168  ;;  %v27_v0 = vld [vmem:[%s184_s0] sm:$0xff]  ;;  %vm32_vm0 = vcmask 261120   ;;  %vm50_vm3 = vcmask 7168   ;;  %s133_s0 = smov [#allocation5]  }
  0x13   :  { %v28_v1 = vld [vmem:[#allocation2] sm:$0xff]  ;;  %s69_s27 = sshll.u32 %s133_s0, 4  ;;  %s70_s27 = int_to_ptr.vmem [resolvable:$true] %s69_s27 }
  0x14   :  { %v30_v2 = vsub.f32 %v27_v0, %v28_v1  ;;  %v29_v12 = vld [vmem:[%s186_s2] sm:$0xff]  ;;  %s106_s28 = scalar_lea.vmem %s70_s27, 128  ;;  %p111_p9 = scmp.lt.s32.totalorder %s70_s27, %s70_s27 }
  0x15   :  { %v46_v14 = vsub.f32 1.0, %v29_v12  ;;  %p107_p8 = scmp.ne.s32.totalorder %s70_s27, %s106_s28  ;;  %p112_p10 = scmp.lt.s32.totalorder %s106_s28, %s106_s28 }
  0x16   :  { %v31_v3 = vmul.f32 %v30_v2, %v30_v2 }
  0x17   :  { %p113_p11 = por %p112_p10, %p111_p9 }
  0x18   :  { %v33_v4 = vsel %vm32_vm0, %v31_v3, 0.0 }
  0x19   :  { %34 = vadd.xlane.f32.xlu0 %v33_v4  ;;  %p114_p12 = pnand %p113_p11, %p107_p8 }
  0xa6   :  { %v35_v5 = vpop.xlane.xlu0 %34 }
  0xa7   :  { %82 = vrsqrt.f32 %v35_v5  ;;  %vm38_vm1 = vcmp.eq.f32.partialorder %v35_v5, inf  ;;  %v41_v8 = vand.u32 2147483648, %v35_v5  ;;  %vm40_vm2 = vcmp.eq.f32.partialorder %v35_v5, 0.0 }
  0xa8   :  { %v45_v16 = vmul.f32 %v35_v5, %v29_v12 }
  0xb1   :  { %v83_v6 = vpop.eup %82 }
  0xb2   :  { %v37_v7 = vmul.f32 %v83_v6, %v35_v5 }
  0xb4   :  { %v39_v9 = vsel %vm38_vm1, %v35_v5, %v37_v7 }
  0xb5   :  { %v42_v10 = vsel %vm40_vm2, %v41_v8, %v39_v9 }
  0xb6   :  { %v43_v11 = vsub.f32 1.0, %v42_v10 }
  0xb8   :  { %v44_v13 = vmax.f32 %v43_v11, 0.0 }
  0xba   :  { %v47_v15 = vmul.f32 %v44_v13, %v44_v13 }
  0xbc   :  { %v48_v17 = vmul.f32 %v47_v15, %v46_v14 }
  0xbe   :  { %v49_v18 = vadd.f32 %v48_v17, %v45_v16 }
  0xc0   :  { %v51_v19 = vsel %vm50_vm3, %v49_v18, 0.0 }
  0xc1   :  { %52 = vadd.xlane.f32.xlu0 %v51_v19 }
 0x14e   :  { %v53_v20 = vpop.xlane.xlu0 %52 }
 0x14f   :  { %v54_v21 = vrot.slane %v53_v20, 4 }
 0x151   :  { %v55_v22 = vadd.f32 %v54_v21, %v53_v20 }
 0x153   :  { %v56_v23 = vrot.slane %v55_v22, 2 }
 0x155   :  { %v57_v24 = vadd.f32 %v56_v23, %v55_v22 }
 0x157   :  { %v58_v25 = vrot.slane %v57_v24, 1 }
 0x159   :  { %v59_v26 = vadd.f32 %v58_v25, %v57_v24 }
 0x15b   :  { %78 = vpush %v59_v26 }
 0x18c   :  { %s79_s2 = spop %78 }
 0x18d   :  { %v61_v27 = vstv %s79_s2 }
 0x18e   :  { %62 = vst [vmem:[#allocation5] sm:$0xff] %v61_v27 }
 0x18f   :  { %117 = shalt.err (!%p114_p12)
}
 0x190   :  { %s118_s4 = scalar_lea.hbm %s187_s3, 128 }
 0x191   :  { %p119_p13 = scmp.ne.s32.totalorder %s187_s3, %s118_s4  ;;  %p122_p0 = scmp.lt.u32.totalorder %s118_s4, %s187_s3 }
 0x193   :  { %p124_p1 = pnand %p122_p0, %p119_p13 }
 0x195   :  { %127 = shalt.err (!%p124_p1)
}
 0x196   :  { %72 = dma.vmem_to_hbm [thread:$0]  %s70_s27, 128, %s187_s3, [#allocation4]  }
 0x197   :  { %130 = dma.done.wait [#allocation4], 128  }
 0x198   :  { %131 = vsyncadd [#allocation4], 4294967168 }
 0x199   :  { %76 = vsyncpa [#allocation3], 1 }
 0x19a   :  { %77 = vsyncpa [#allocation4], 1 }

</bundles_post_ra>
